<compile_context>
chip_gen: v7x
topology: tpu7x:2x2x1
jax: 0.10.0
libtpu: 0.0.40
codegen_flags: <defaults>
</compile_context>

<pallas_src>
import jax
import jax.numpy as jnp
from jax.experimental import pallas as pl
from jax.experimental.pallas import tpu as pltpu


def _make_kernel(negative_slope=0.1):
    def kernel(x_ref, w1_ref, b1_ref, w2_ref, b2_ref, o_ref):
        # x_ref : (TB, 12)   lane-packed three 4-wide feature groups
        # w1_ref: (12, 3C)   block-diagonal layer-1 weights, K-major
        # b1_ref: (1, 3C)    concatenated layer-1 biases
        # w2_ref: (3C, 3C)   block-diagonal layer-2 weights, K-major
        # b2_ref: (1, 3C)    concatenated layer-2 biases
        # o_ref : (TB, 3C)
        x = x_ref[...].astype(w1_ref.dtype)
        # Linear(12->3C, block-diagonal) + LeakyReLU(0.1); f32 accumulation
        h = jnp.dot(x, w1_ref[...], preferred_element_type=jnp.float32)
        h = h + b1_ref[...].astype(jnp.float32)
        h = jnp.maximum(h, negative_slope * h)
        # Linear(3C->3C, block-diagonal) + LeakyReLU(0.1)
        y = jnp.dot(h.astype(w2_ref.dtype), w2_ref[...],
                    preferred_element_type=jnp.float32)
        y = y + b2_ref[...].astype(jnp.float32)
        y = jnp.maximum(y, negative_slope * y)
        # single lane-dense store of the already-concatenated result
        o_ref[...] = y.astype(o_ref.dtype)

    return kernel


def _round_up(v, m):
    return -(-v // m) * m


def _padded_vmem_bytes(shape, dtype):
    """VMEM footprint: minor dim pads to 128 lanes, second-minor to the sublane tile."""
    elt = jnp.dtype(dtype).itemsize
    sublane = {4: 8, 2: 16, 1: 32}.get(elt, 8)
    if len(shape) == 1:
        return _round_up(shape[0], 128) * elt
    lead = 1
    for d in shape[:-2]:
        lead *= int(d)
    return lead * _round_up(shape[-2], sublane) * _round_up(shape[-1], 128) * elt


def _block_diag3(mats):
    """mats: (3, K, N) -> (3K, 3N) block diagonal."""
    n, K, N = mats.shape
    out = jnp.zeros((n * K, n * N), mats.dtype)
    for g in range(n):
        out = out.at[g * K:(g + 1) * K, g * N:(g + 1) * N].set(mats[g])
    return out


def continuous_feature_embedding2(x, ncf, w1, b1, w2, b2, *,
                                  batch_tile=None, negative_slope=0.1):
    """x: (B, F) with F >= 3*ncf; w1: (3, C, 4); b1: (3, C); w2: (3, C, C); b2: (3, C)."""
    B = x.shape[0]
    C = w1.shape[1]
    assert w1.shape == (3, C, 4) and w2.shape == (3, C, C)
    assert b1.shape == (3, C) and b2.shape == (3, C)
    assert ncf >= 4 and x.shape[1] >= 3 * ncf

    out_w = 3 * C
    x_elt = jnp.dtype(x.dtype).itemsize
    w_dtype = w1.dtype

    # ---- one-time weight prep (outside the grid, tiny tensors) -------------
    w1_bd = _block_diag3(jnp.swapaxes(w1, 1, 2))      # (12, 3C), K-major
    w2_bd = _block_diag3(jnp.swapaxes(w2, 1, 2))      # (3C, 3C), K-major
    b1_cat = b1.reshape(1, out_w)
    b2_cat = b2.reshape(1, out_w)

    # Lane-packed input slab: the three 4-wide column groups -> (B, 12).
    x12 = jnp.concatenate([x[:, k * ncf - 4:k * ncf] for k in (1, 2, 3)], axis=-1)

    # ---- VMEM capacity (generation-aware: v7x only has 64 MiB per TC) ------
    try:
        vmem_cap = int(pltpu.get_tpu_info().vmem_capacity_bytes)
    except Exception:
        vmem_cap = 64 * 2 ** 20                       # conservative fallback
    vmem_ceiling = (min(vmem_cap, 128 * 2 ** 20) * 7) // 8   # leave headroom

    # Resident weight/bias footprint (default depth-2 buffering).
    w_bytes = 2 * (_padded_vmem_bytes(w1_bd.shape, w_dtype)
                   + _padded_vmem_bytes(w2_bd.shape, w_dtype)
                   + _padded_vmem_bytes(b1_cat.shape, w_dtype)
                   + _padded_vmem_bytes(b2_cat.shape, w_dtype))

    # Lane-padded per-batch-row bytes: double-buffered (TB,12) input,
    # double-buffered (TB,3C) output, plus live f32 (TB,3C) activation slabs.
    lanes_in = _round_up(12, 128)
    lanes_out = _round_up(out_w, 128)
    per_row = 2 * lanes_in * x_elt + 2 * lanes_out * x_elt + 2 * lanes_out * 4

    if batch_tile is None:
        budget = max(vmem_ceiling // 2 - w_bytes, 8 * per_row)
        batch_tile = min(2048, (budget // per_row) // 8 * 8)
        if B > 16:
            # keep >= 2 grid steps (v7x 2-TC split, DMA/compute overlap)
            batch_tile = min(batch_tile, _round_up(-(-B // 2), 8))
        batch_tile = max(8, min(batch_tile, _round_up(B, 8)))

    grid_b = -(-B // batch_tile)
    if grid_b > 1 and grid_b % 2:
        grid_b += 1                                    # even grid for the 2-TC split
    B_pad = grid_b * batch_tile
    if B_pad != B:
        x12 = jnp.pad(x12, ((0, B_pad - B), (0, 0)))

    vmem_need = w_bytes + batch_tile * per_row
    vmem_limit = int(min(vmem_ceiling, max(16 * 2 ** 20, 2 * vmem_need)))

    flops = int(2 * B_pad * (12 * out_w + out_w * out_w))
    bytes_accessed = int(
        B_pad * 12 * x_elt
        + (w1_bd.size + w2_bd.size + b1_cat.size + b2_cat.size)
        * jnp.dtype(w_dtype).itemsize
        + B_pad * out_w * x_elt)

    out = pl.pallas_call(
        _make_kernel(negative_slope),
        out_shape=jax.ShapeDtypeStruct((B_pad, out_w), x.dtype),
        grid_spec=pltpu.PrefetchScalarGridSpec(
            num_scalar_prefetch=0,
            grid=(grid_b,),
            in_specs=[
                pl.BlockSpec((batch_tile, 12), lambda i: (i, 0)),
                # constant index maps -> weights DMA'd once, resident in VMEM
                pl.BlockSpec((12, out_w), lambda i: (0, 0)),
                pl.BlockSpec((1, out_w), lambda i: (0, 0)),
                pl.BlockSpec((out_w, out_w), lambda i: (0, 0)),
                pl.BlockSpec((1, out_w), lambda i: (0, 0)),
            ],
            out_specs=pl.BlockSpec((batch_tile, out_w), lambda i: (i, 0)),
        ),
        compiler_params=pltpu.CompilerParams(
            dimension_semantics=("parallel",),
            vmem_limit_bytes=vmem_limit,
        ),
        cost_estimate=pl.CostEstimate(
            flops=flops, transcendentals=0, bytes_accessed=bytes_accessed),
    )(x12, w1_bd, b1_cat, w2_bd, b2_cat)

    return out[:B] if B_pad != B else out


def reference(x, ncf, w1, b1, w2, b2, negative_slope=0.1):
    """Pure-JAX reference mirroring the PyTorch forward."""
    outs = []
    for k in (1, 2, 3):
        xs = x[:, k * ncf - 4:k * ncf]
        h = xs @ w1[k - 1].T + b1[k - 1]
        h = jnp.where(h > 0, h, negative_slope * h)
        y = h @ w2[k - 1].T + b2[k - 1]
        y = jnp.where(y > 0, y, negative_slope * y)
        outs.append(y)
    return jnp.concatenate(outs, axis=-1)


if __name__ == "__main__":
    ncf, C = 8, 32                  # n_continous_features, out_channels

    key = jax.random.PRNGKey(0)
    kx, k1, k2, k3, k4 = jax.random.split(key, 5)

    # Deterministic stand-ins for nn.Linear default init.
    w1 = 0.5 * jax.random.normal(k1, (3, C, 4), dtype=jnp.float32)
    b1 = 0.1 * jax.random.normal(k2, (3, C), dtype=jnp.float32)
    w2 = (1.0 / jnp.sqrt(C)) * jax.random.normal(k3, (3, C, C), dtype=jnp.float32)
    b2 = 0.1 * jax.random.normal(k4, (3, C), dtype=jnp.float32)

    # Small batch (grid of 1).
    x_small = jax.random.normal(kx, (8, 3 * ncf), dtype=jnp.float32)
    out_small = jax.block_until_ready(
        continuous_feature_embedding2(x_small, ncf, w1, b1, w2, b2))
    ref_small = reference(x_small, ncf, w1, b1, w2, b2)
    assert out_small.shape == (8, 3 * C)
    assert jnp.allclose(out_small, ref_small, atol=1e-4, rtol=1e-4)

    # Ragged batch exercising padding + multi-step (even) grid.
    x_big = jax.random.normal(kx, (40, 3 * ncf), dtype=jnp.float32)
    out_big = jax.block_until_ready(
        continuous_feature_embedding2(x_big, ncf, w1, b1, w2, b2))
    ref_big = reference(x_big, ncf, w1, b1, w2, b2)
    assert out_big.shape == (40, 3 * C)
    assert jnp.allclose(out_big, ref_big, atol=1e-4, rtol=1e-4)

    print("KERNEL_OK")
</pallas_src>

<mosaic_0001>
module attributes {stable_mosaic.version = 11 : i64} {
  func.func @kernel(%arg0: i32, %arg1: memref<8x12xf32, #tpu.memory_space<vmem>>, %arg2: memref<12x96xf32, #tpu.memory_space<vmem>>, %arg3: memref<1x96xf32, #tpu.memory_space<vmem>>, %arg4: memref<96x96xf32, #tpu.memory_space<vmem>>, %arg5: memref<1x96xf32, #tpu.memory_space<vmem>>, %arg6: memref<8x96xf32, #tpu.memory_space<vmem>>) attributes {dimension_semantics = [#tpu.dimension_semantics<parallel>], iteration_bounds = array<i64: 1>, scalar_prefetch = 0 : i64, scratch_operands = 0 : i64, tpu.core_type = #tpu.core_type<tc>, window_params = [{transform_indices = @transform_0, window_bounds = array<i64: 8, 12>}, {pipeline_mode = #tpu.pipeline_mode<synchronous>, transform_indices = @transform_1, window_bounds = array<i64: 12, 96>}, {pipeline_mode = #tpu.pipeline_mode<synchronous>, transform_indices = @transform_2, window_bounds = array<i64: 1, 96>}, {pipeline_mode = #tpu.pipeline_mode<synchronous>, transform_indices = @transform_3, window_bounds = array<i64: 96, 96>}, {pipeline_mode = #tpu.pipeline_mode<synchronous>, transform_indices = @transform_4, window_bounds = array<i64: 1, 96>}, {transform_indices = @transform_5, window_bounds = array<i64: 8, 96>}]} {
    %c0 = arith.constant 0 : index
    %c0_0 = arith.constant 0 : index
    %0 = vector.load %arg1[%c0, %c0_0] : memref<8x12xf32, #tpu.memory_space<vmem>>, vector<8x12xf32>
    %c0_1 = arith.constant 0 : index
    %c0_2 = arith.constant 0 : index
    %1 = vector.load %arg2[%c0_1, %c0_2] : memref<12x96xf32, #tpu.memory_space<vmem>>, vector<12x96xf32>
    %cst = arith.constant dense<0.000000e+00> : vector<8x96xf32>
    %2 = tpu.matmul %0, %1, %cst {dimension_numbers = #tpu.dot_dimension_numbers<[1], [0], [0], [1], [0, 0, 1, 1], [], []>} : vector<8x12xf32>, vector<12x96xf32>, vector<8x96xf32> -> vector<8x96xf32>
    %c0_3 = arith.constant 0 : index
    %c0_4 = arith.constant 0 : index
    %3 = vector.load %arg3[%c0_3, %c0_4] : memref<1x96xf32, #tpu.memory_space<vmem>>, vector<1x96xf32>
    %4 = vector.broadcast %3 : vector<1x96xf32> to vector<8x96xf32>
    %5 = arith.addf %2, %4 : vector<8x96xf32>
    %cst_5 = arith.constant 1.000000e-01 : f32
    %6 = vector.broadcast %cst_5 : f32 to vector<8x96xf32>
    %7 = arith.mulf %6, %5 : vector<8x96xf32>
    %8 = arith.maximumf %5, %7 : vector<8x96xf32>
    %c0_6 = arith.constant 0 : index
    %c0_7 = arith.constant 0 : index
    %9 = vector.load %arg4[%c0_6, %c0_7] : memref<96x96xf32, #tpu.memory_space<vmem>>, vector<96x96xf32>
    %cst_8 = arith.constant dense<0.000000e+00> : vector<8x96xf32>
    %10 = tpu.matmul %8, %9, %cst_8 {dimension_numbers = #tpu.dot_dimension_numbers<[1], [0], [0], [1], [0, 0, 1, 1], [], []>} : vector<8x96xf32>, vector<96x96xf32>, vector<8x96xf32> -> vector<8x96xf32>
    %c0_9 = arith.constant 0 : index
    %c0_10 = arith.constant 0 : index
    %11 = vector.load %arg5[%c0_9, %c0_10] : memref<1x96xf32, #tpu.memory_space<vmem>>, vector<1x96xf32>
    %12 = vector.broadcast %11 : vector<1x96xf32> to vector<8x96xf32>
    %13 = arith.addf %10, %12 : vector<8x96xf32>
    %cst_11 = arith.constant 1.000000e-01 : f32
    %14 = vector.broadcast %cst_11 : f32 to vector<8x96xf32>
    %15 = arith.mulf %14, %13 : vector<8x96xf32>
    %16 = arith.maximumf %13, %15 : vector<8x96xf32>
    %c0_12 = arith.constant 0 : index
    %c0_13 = arith.constant 0 : index
    %17 = vector.load %arg6[%c0_12, %c0_13] : memref<8x96xf32, #tpu.memory_space<vmem>>, vector<8x96xf32>
    tpu.vector_store %arg6[%c0_12, %c0_13], %16 {strides = array<i32>} : memref<8x96xf32, #tpu.memory_space<vmem>>, vector<8x96xf32>,
    return
  }
  func.func @transform_0(%arg0: i32) -> (i32, i32) {
    %c0_i32 = arith.constant 0 : i32
    %c0_i32_0 = arith.constant 0 : i32
    return %arg0, %c0_i32 : i32, i32
  }
  func.func @transform_1(%arg0: i32) -> (i32, i32) {
    %c0_i32 = arith.constant 0 : i32
    %c0_i32_0 = arith.constant 0 : i32
    %c0_i32_1 = arith.constant 0 : i32
    return %c0_i32, %c0_i32_0 : i32, i32
  }
  func.func @transform_2(%arg0: i32) -> (i32, i32) {
    %c0_i32 = arith.constant 0 : i32
    %c0_i32_0 = arith.constant 0 : i32
    %c0_i32_1 = arith.constant 0 : i32
    return %c0_i32, %c0_i32_0 : i32, i32
  }
  func.func @transform_3(%arg0: i32) -> (i32, i32) {
    %c0_i32 = arith.constant 0 : i32
    %c0_i32_0 = arith.constant 0 : i32
    %c0_i32_1 = arith.constant 0 : i32
    return %c0_i32, %c0_i32_0 : i32, i32
  }
  func.func @transform_4(%arg0: i32) -> (i32, i32) {
    %c0_i32 = arith.constant 0 : i32
    %c0_i32_0 = arith.constant 0 : i32
    %c0_i32_1 = arith.constant 0 : i32
    return %c0_i32, %c0_i32_0 : i32, i32
  }
  func.func @transform_5(%arg0: i32) -> (i32, i32) {
    %c0_i32 = arith.constant 0 : i32
    %c0_i32_0 = arith.constant 0 : i32
    return %arg0, %c0_i32 : i32, i32
  }
}

</mosaic_0001>

<bundles_post_ra>
// kernel: tpu_custom_call.1
= control target key start
LH: loop header
LB: loop body
LE: loop exit
PB: predicated region body
PF: predicated region fallthrough
CT: control target
= control target key end

     0   :  { %10 = vsyncpa [#allocation3], 0  ;;  %s543_s0 = inlined_call_operand.hbm [shape: f32[8,12], index: 0, kind: input, shape index: {}]   ;;  %s544_s1 = inlined_call_operand.hbm [shape: f32[12,96], index: 1, kind: input, shape index: {}]   ;;  %s545_s2 = inlined_call_operand.vmem [shape: f32[1,96], index: 2, kind: input, shape index: {}]   ;;  %s546_s3 = inlined_call_operand.hbm [shape: f32[96,96], index: 3, kind: input, shape index: {}]   ;;  %s547_s4 = inlined_call_operand.vmem [shape: f32[1,96], index: 4, kind: input, shape index: {}]   ;;  %s548_s5 = inlined_call_operand.hbm [shape: f32[8,96], index: 5, kind: output, shape index: {}]  }
   0x1   :  { %11 = vsyncpa [#allocation6], 0 }
   0x2   :  { %12 = vsyncpa [#allocation4], 0  ;;  %s443_s18 = smov [#allocation5]   ;;  %s349_s22 = scalar_lea.hbm %s544_s1, 256 }
   0x3   :  { %s28_s19 = sshll.u32 %s443_s18, 4  ;;  %p350_p0 = scmp.ne.s32.totalorder %s544_s1, %s349_s22  ;;  %s29_s19 = int_to_ptr.vmem [resolvable:$true] %s28_s19 }
   0x4   :  { %p353_p1 = scmp.lt.u32.totalorder %s349_s22, %s544_s1 }
   0x6   :  { %p355_p2 = pnand %p353_p1, %p350_p0 }
   0x8   :  { %358 = shalt.err (!%p355_p2)
}
   0x9   :  { %s359_s27 = scalar_lea.vmem %s29_s19, 256  ;;  %p364_p4 = scmp.lt.s32.totalorder %s29_s19, %s29_s19 }
   0xa   :  { %p360_p3 = scmp.ne.s32.totalorder %s29_s19, %s359_s27  ;;  %p365_p5 = scmp.lt.s32.totalorder %s359_s27, %s359_s27 }
   0xc   :  { %p366_p6 = por %p365_p5, %p364_p4 }
   0xe   :  { %p367_p7 = pnand %p366_p6, %p360_p3 }
  0x10   :  { %370 = shalt.err (!%p367_p7)
}
  0x11   :  { %s444_s28 = smov 128   ;;  %s445_s29 = smov 8  }
  0x12   :  { %34 = dma.hbm_to_vmem [thread:$0]  %s544_s1, 256, %s29_s19, [#allocation6], %s444_s28, %s444_s28, %s445_s29  }
  0x13   :  { %s446_s7 = smov [#allocation2]   ;;  %s447_s9 = smov [#allocation7]  }
  0x14   :  { %s19_s8 = sshll.u32 %s446_s7, 4  ;;  %s42_s10 = sshll.u32 %s447_s9, 4  ;;  %s20_s8 = int_to_ptr.vmem [resolvable:$true] %s19_s8  ;;  %s43_s10 = int_to_ptr.vmem [resolvable:$true] %s42_s10 }
  0x15   :  { %s371_s13 = scalar_lea.hbm %s543_s0, 128 }
  0x16   :  { %p372_p8 = scmp.ne.s32.totalorder %s543_s0, %s371_s13  ;;  %p375_p9 = scmp.lt.u32.totalorder %s371_s13, %s543_s0 }
  0x18   :  { %p377_p10 = pnand %p375_p9, %p372_p8 }
  0x1a   :  { %380 = shalt.err (!%p377_p10)
}
  0x1b   :  { %s381_s1 = scalar_lea.vmem %s20_s8, 128  ;;  %p386_p12 = scmp.lt.s32.totalorder %s20_s8, %s20_s8 }
  0x1c   :  { %p382_p11 = scmp.ne.s32.totalorder %s20_s8, %s381_s1  ;;  %p387_p13 = scmp.lt.s32.totalorder %s381_s1, %s381_s1 }
  0x1e   :  { %p388_p0 = por %p387_p13, %p386_p12 }
  0x20   :  { %p389_p1 = pnand %p388_p0, %p382_p11 }
  0x22   :  { %392 = shalt.err (!%p389_p1)
}
  0x23   :  { %22 = dma.hbm_to_vmem [thread:$0]  %s543_s0, 128, %s20_s8, [#allocation3]  }
  0x24   :  { %s393_s22 = scalar_lea.hbm %s546_s3, 1536 }
  0x25   :  { %p394_p2 = scmp.ne.s32.totalorder %s546_s3, %s393_s22  ;;  %p397_p3 = scmp.lt.u32.totalorder %s393_s22, %s546_s3 }
  0x27   :  { %p399_p4 = pnand %p397_p3, %p394_p2 }
  0x29   :  { %402 = shalt.err (!%p399_p4)
}
  0x2a   :  { %s403_s27 = scalar_lea.vmem %s43_s10, 1536  ;;  %p408_p6 = scmp.lt.s32.totalorder %s43_s10, %s43_s10 }
  0x2b   :  { %p404_p5 = scmp.ne.s32.totalorder %s43_s10, %s403_s27  ;;  %p409_p7 = scmp.lt.s32.totalorder %s403_s27, %s403_s27 }
  0x2d   :  { %p410_p8 = por %p409_p7, %p408_p6 }
  0x2f   :  { %p411_p9 = pnand %p410_p8, %p404_p5 }
  0x31   :  { %414 = shalt.err (!%p411_p9)
}
  0x32   :  { %48 = dma.hbm_to_vmem [thread:$0]  %s546_s3, 1536, %s43_s10, [#allocation6], %s444_s28, %s444_s28, %s445_s29  }
  0x33   :  { %437 = dma.done.wait [#allocation3], 128  }
  0x34   :  { %438 = vsyncadd [#allocation3], 4294967168 }
  0x35   :  { %439 = dma.done.wait [#allocation6], 1792  }
  0x36   :  { %440 = vsyncadd [#allocation6], 4294965504  ;;  %v448_v0 = vmov 0.0|0.0   ;;  %vm449_vm0 = vmmov 0   ;;  %v450_v1 = vmov 0.0   ;;  %vm74_vm1 = vcmask 1043456  }
  0x37   :  { %317 = vmatprep.subr.bf16.mxu0 %v448_v0  ;;  %321 = vmatprep.subr.bf16.mxu1 %v448_v0  ;;  %v61_v2 = vld [vmem:[#allocation5] sm:$0xff]  ;;  %v62_v3 = vld [vmem:[#allocation5 + $0x8] sm:$0xf]  ;;  %vm451_vm2 = vmmov 1   ;;  %v150_v5 = vld [vmem:[#allocation7] sm:$0xff]  ;;  %vm70_vm4 = vcmask 97280  }
  0x38   :  { %287 = vmatprep.mubr.msk.f32.mxu0 %vm449_vm0, %v450_v1  ;;  %314 = vmatprep.mubr.msk.f32.mxu1 %vm449_vm0, %v450_v1  ;;  %vm319_vm3 = vmpackc.low %vm74_vm1, %vm451_vm2  ;;  %v318_v4 = vpack.c.bf16 %v62_v3, %v61_v2  ;;  %v151_v6 = vld [vmem:[#allocation7 + $0x8] sm:$0xff]  ;;  %v152_v7 = vld [vmem:[#allocation7 + $0x10] sm:$0xff]  ;;  %vm169_vm5 = vcmask 785408   ;;  %s452_s7 = smov [#allocation8]  }
  0x39   :  { %v322_v8 = vpack.c.bf16 %v151_v6, %v150_v5  ;;  %v153_v9 = vld [vmem:[#allocation7 + $0x18] sm:$0xff]  ;;  %v60_v10 = vld [vmem:[#allocation2] sm:$0xff]  ;;  %v154_v12 = vld [vmem:[#allocation7 + $0x20] sm:$0xff]  ;;  %s252_s8 = sshll.u32 %s452_s7, 4  ;;  %s253_s8 = int_to_ptr.vmem [resolvable:$true] %s252_s8 }
  0x3a   :  { %320 = vmatpush3.bf16.msk.msra.mxu0 %vm319_vm3, %v318_v4  ;;  %v325_v11 = vpack.c.bf16 %v153_v9, %v152_v7  ;;  %v155_v13 = vld [vmem:[#allocation7 + $0x28] sm:$0xff]  ;;  %v156_v15 = vld [vmem:[#allocation7 + $0x30] sm:$0xff]  ;;  %v157_v16 = vld [vmem:[#allocation7 + $0x38] sm:$0xff]  ;;  %p420_p11 = scmp.lt.s32.totalorder %s253_s8, %s253_s8 }
  0x3b   :  { %323 = vmatpush3.bf16.msra.mxu1 %v322_v8  ;;  %v328_v14 = vpack.c.bf16 %v155_v13, %v154_v12  ;;  %v331_v17 = vpack.c.bf16 %v157_v16, %v156_v15  ;;  %v158_v18 = vld [vmem:[#allocation7 + $0x40] sm:$0xff]  ;;  %v159_v19 = vld [vmem:[#allocation7 + $0x48] sm:$0xff]  ;;  %v160_v21 = vld [vmem:[#allocation7 + $0x50] sm:$0xff] }
  0x3c   :  { %324 = vmatprep.subr.bf16.mxu1 %v448_v0  ;;  %v334_v20 = vpack.c.bf16 %v159_v19, %v158_v18  ;;  %v161_v22 = vld [vmem:[#allocation7 + $0x58] sm:$0xff]  ;;  %v262_v24 = vld [vmem:[%s545_s2] ss:$0 sm:$0xff]  ;;  %s415_s2 = scalar_lea.vmem %s253_s8, 128 }
  0x3d   :  { %288 = vmatmul.mubr.msk.f32.vlgmr.msra.gmra.mrb[0].mxu0 %vm70_vm4, %v60_v10  ;;  %v337_v23 = vpack.c.bf16 %v161_v22, %v160_v21  ;;  %v265_v30 = vld [vmem:[%s547_s4] ss:$0 sm:$0xff]  ;;  %p416_p10 = scmp.ne.s32.totalorder %s253_s8, %s415_s2  ;;  %p421_p12 = scmp.lt.s32.totalorder %s415_s2, %s415_s2 }
  0x3f   :  { %326 = vmatpush3.bf16.msra.mxu1 %v325_v11  ;;  %p422_p13 = por %p421_p12, %p420_p11 }
  0x40   :  { %327 = vmatprep.subr.bf16.mxu1 %v448_v0 }
  0x41   :  { %p423_p0 = pnand %p422_p13, %p416_p10 }
  0x43   :  { %329 = vmatpush3.bf16.msra.mxu1 %v328_v14 }
  0x44   :  { %330 = vmatprep.subr.bf16.mxu1 %v448_v0 }
  0x47   :  { %332 = vmatpush3.bf16.msra.mxu1 %v331_v17 }
  0x48   :  { %333 = vmatprep.subr.bf16.mxu1 %v448_v0 }
  0x4b   :  { %335 = vmatpush3.bf16.msra.mxu1 %v334_v20 }
  0x4c   :  { %336 = vmatprep.subr.bf16.mxu1 %v448_v0 }
  0x4f   :  { %338 = vmatpush3.bf16.msra.mxu1 %v337_v23 }
 0x110   :  { %v144_v25 = vpop.f32.mrb[0].mxu0 }
 0x111   :  { %v145_v26 = vadd.f32 %v262_v24, %v144_v25  ;;  %v289_v27 = vpop.f32.mrb[1].mxu0 }
 0x113   :  { %v148_v28 = vmul.f32 0.1, %v145_v26 }
 0x115   :  { %v149_v29 = vmax.f32 %v145_v26, %v148_v28 }
 0x117   :  { %315 = vmatmul.mubr.msk.f32.vlgmr.msra.gmra.mrb[0].mxu1 %vm169_vm5, %v149_v29 }
 0x1ea   :  { %v239_v31 = vpop.f32.mrb[0].mxu1 }
 0x1eb   :  { %v240_v32 = vadd.f32 %v265_v30, %v239_v31  ;;  %v316_v33 = vpop.f32.mrb[1].mxu1 }
 0x1ed   :  { %v243_v34 = vmul.f32 0.1, %v240_v32 }
 0x1ef   :  { %v244_v35 = vmax.f32 %v240_v32, %v243_v34 }
 0x1f1   :  { %245 = vst.msk [vmem:[#allocation8] sm:$0xff] %vm169_vm5, %v244_v35 }
 0x1f2   :  { %426 = shalt.err (!%p423_p0)
}
 0x1f3   :  { %s427_s4 = scalar_lea.hbm %s548_s5, 128 }
 0x1f4   :  { %p428_p1 = scmp.ne.s32.totalorder %s548_s5, %s427_s4  ;;  %p431_p2 = scmp.lt.u32.totalorder %s427_s4, %s548_s5 }
 0x1f6   :  { %p433_p3 = pnand %p431_p2, %p428_p1 }
 0x1f8   :  { %436 = shalt.err (!%p433_p3)
}
 0x1f9   :  { %255 = dma.vmem_to_hbm [thread:$0]  %s253_s8, 128, %s548_s5, [#allocation4]  }
 0x1fa   :  { %441 = dma.done.wait [#allocation4], 128  }
 0x1fb   :  { %442 = vsyncadd [#allocation4], 4294967168 }
 0x1fc   :  { %259 = vsyncpa [#allocation3], 1 }
 0x1fd   :  { %260 = vsyncpa [#allocation6], 1 }
 0x1fe   :  { %261 = vsyncpa [#allocation4], 1 }

</bundles_post_ra>
